<compile_context>
chip_gen: v5e
topology: v5e:2x2
jax: 0.10.0
libtpu: 0.0.40
codegen_flags: <defaults>
</compile_context>

<pallas_src>
import functools

import jax
import jax.numpy as jnp
from jax.experimental import pallas as pl
from jax.experimental.pallas import tpu as pltpu


_TARGET_TILE_BYTES = 3 * 1024 * 1024      # per input, per pipeline buffer
_VMEM_LIMIT_BYTES = 48 * 1024 * 1024      # < 64 MiB (v7x physical); << 128 MiB (v5e/v6e)


def _wbce_kernel(x_ref, t_ref, w_ref, num_ref, den_ref, *,
                 total_rows, block_rows, steps_per_core, needs_mask,
                 vector_acc):
    """One (TB, LANE) tile of weighted BCE-with-logits.

    x_ref, t_ref, w_ref : (TB, LANE) VMEM tiles (any float dtype)
    num_ref, den_ref    : (1, 8, LANE) f32 output blocks.  Their block index is
                          constant along the inner ("arbitrary") grid axis, so
                          they stay resident in VMEM and act as accumulators:
                          num = sum(w * bce) partials, den = sum(w) partials.
    """
    i = pl.program_id(1)                      # streaming / reduction axis

    @pl.when(i == 0)
    def _init():
        num_ref[...] = jnp.zeros_like(num_ref)
        den_ref[...] = jnp.zeros_like(den_ref)

    # Upcast in-vreg only (storage dtype may be bf16); accumulate in f32.
    x = x_ref[...].astype(jnp.float32)
    t = t_ref[...].astype(jnp.float32)
    w = w_ref[...].astype(jnp.float32)

    # Numerically-stable BCE with logits (matches torch.nn.BCEWithLogitsLoss):
    #   bce = max(x, 0) - x*t + log(1 + exp(-|x|))
    bce = jnp.maximum(x, 0.0) - x * t + jnp.log1p(jnp.exp(-jnp.abs(x)))
    num_v = w * bce
    den_v = w

    if needs_mask:
        # Mask Pallas-padded rows of partial / duplicated (clamped) tiles so
        # garbage (possibly inf/nan) never leaks into either sum.
        # (2-D iota; 1-D iota is not supported on TPU.)
        block_idx = pl.program_id(0) * steps_per_core + i
        row = (jax.lax.broadcasted_iota(jnp.int32, x.shape, 0)
               + block_idx * block_rows)
        valid = row < total_rows
        num_v = jnp.where(valid, num_v, 0.0)
        den_v = jnp.where(valid, den_v, 0.0)

    lane = x.shape[-1]
    if vector_acc:
        # Pure VPU adds of whole vregs; no per-step cross-lane reduce.
        num_ref[...] += num_v.reshape(block_rows // 8, 8, lane).sum(axis=0)[None]
        den_ref[...] += den_v.reshape(block_rows // 8, 8, lane).sum(axis=0)[None]
    else:
        # Tiny single-block fallback (block_rows not a multiple of 8).
        sub = jax.lax.broadcasted_iota(jnp.int32, (8, lane), 0)
        ln = jax.lax.broadcasted_iota(jnp.int32, (8, lane), 1)
        at00 = (sub == 0) & (ln == 0)
        num_ref[...] += jnp.where(at00, jnp.sum(num_v), 0.0)[None]
        den_ref[...] += jnp.where(at00, jnp.sum(den_v), 0.0)[None]


def _choose_lane(n):
    """Pick a lane width (multiple of 128) and the zero-pad needed to use it."""
    for lane in (1024, 512, 256, 128):
        if n % lane == 0:
            return lane, 0
    lane = 128
    pad = pl.cdiv(n, lane) * lane - n
    return lane, pad


def weighted_bce_loss(output, target, weights, *, block_rows=None,
                      num_core_splits=2):
    """JAX wrapper mirroring WeightedBCELoss.forward.  Returns an f32 scalar."""
    assert output.shape == target.shape == weights.shape, "shapes must match"

    n = int(output.size)
    x = output.reshape(-1)
    t = target.reshape(-1)
    w = weights.reshape(-1)

    lane, pad = _choose_lane(n)
    if pad:
        # Padded elements carry weight 0 and a finite bce (logit=0, target=0),
        # so they contribute 0 to both sums.  Only hit when B*C % 128 != 0.
        x = jnp.pad(x, (0, pad))
        t = jnp.pad(t, (0, pad))
        w = jnp.pad(w, (0, pad))
    rows = (n + pad) // lane
    x = x.reshape(rows, lane)
    t = t.reshape(rows, lane)
    w = w.reshape(rows, lane)

    itemsize = max(jnp.dtype(a.dtype).itemsize for a in (x, t, w))
    sublane = {4: 8, 2: 16, 1: 32}.get(itemsize, 8)

    if block_rows is not None:
        assert block_rows >= 8 and block_rows % 8 == 0
        tb = block_rows
    else:
        tb = max(_TARGET_TILE_BYTES // (lane * itemsize), sublane)
        tb = (tb // sublane) * sublane
    if tb >= rows:
        tb = rows            # single block spanning the full row dim (legal)

    steps_total = pl.cdiv(rows, tb)
    splits = min(num_core_splits, steps_total)   # 2-way split: ~2x on v7x
    steps_per_core = pl.cdiv(steps_total, splits)
    needs_mask = (splits * steps_per_core * tb != rows)
    vector_acc = (tb % 8 == 0)

    kernel = functools.partial(
        _wbce_kernel, total_rows=rows, block_rows=tb,
        steps_per_core=steps_per_core, needs_mask=needs_mask,
        vector_acc=vector_acc)

    last_block = steps_total - 1

    def in_map(c, i):
        # Clamp so a core assigned fewer real blocks re-reads the last
        # in-bounds block; the flat-row mask zeroes its contribution.
        return (jnp.minimum(c * steps_per_core + i, last_block), 0)

    def out_map(c, i):
        return (c, 0, 0)

    bytes_in = sum(a.size * jnp.dtype(a.dtype).itemsize for a in (x, t, w))
    cost = pl.CostEstimate(
        flops=8 * rows * lane,
        transcendentals=2 * rows * lane,
        bytes_accessed=bytes_in + 2 * splits * 8 * lane * 4,
    )

    num_p, den_p = pl.pallas_call(
        kernel,
        out_shape=(jax.ShapeDtypeStruct((splits, 8, lane), jnp.float32),
                   jax.ShapeDtypeStruct((splits, 8, lane), jnp.float32)),
        grid_spec=pltpu.PrefetchScalarGridSpec(
            num_scalar_prefetch=0,
            grid=(splits, steps_per_core),
            in_specs=[
                pl.BlockSpec((tb, lane), in_map),    # logits
                pl.BlockSpec((tb, lane), in_map),    # target
                pl.BlockSpec((tb, lane), in_map),    # weights
            ],
            out_specs=(
                pl.BlockSpec((1, 8, lane), out_map),  # sum(w * bce) partials
                pl.BlockSpec((1, 8, lane), out_map),  # sum(w) partials
            ),
        ),
        compiler_params=pltpu.CompilerParams(
            dimension_semantics=("parallel", "arbitrary"),
            vmem_limit_bytes=_VMEM_LIMIT_BYTES,
        ),
        cost_estimate=cost,
    )(x, t, w)

    # Final cross-core / cross-lane reduction + divide (tiny, done by XLA).
    return jnp.sum(num_p) / jnp.sum(den_p)


def _reference(output, target, weights):
    """Pure-JAX reference mirroring the PyTorch forward."""
    x = output.astype(jnp.float32)
    t = target.astype(jnp.float32)
    w = weights.astype(jnp.float32)
    bce = jnp.maximum(x, 0.0) - x * t + jnp.log1p(jnp.exp(-jnp.abs(x)))
    return jnp.sum(bce * w) / jnp.sum(w)


if __name__ == "__main__":
    def make(key, shape, dtype=jnp.float32):
        k1, k2, k3 = jax.random.split(key, 3)
        logits = jax.random.normal(k1, shape, dtype=jnp.float32).astype(dtype)
        target = (jax.random.uniform(k2, shape) > 0.5).astype(dtype)
        weights = jax.random.uniform(k3, shape, minval=0.1,
                                     maxval=2.0).astype(dtype)
        return logits, target, weights

    # Case 1: small (batch, num_classes); 256 elements -> one lane-dense block.
    a = make(jax.random.PRNGKey(0), (8, 32))
    l1 = jax.block_until_ready(weighted_bce_loss(*a))
    r1 = _reference(*a)
    assert jnp.allclose(l1, r1, rtol=1e-5, atol=1e-6), (l1, r1)

    # Case 2: multi-step streaming, 2-way "parallel" core split and masked
    # partial tile (80*24 = 1920 elems -> (15, 128); block_rows=8 -> 2 blocks).
    b = make(jax.random.PRNGKey(1), (80, 24))
    l2 = jax.block_until_ready(weighted_bce_loss(*b, block_rows=8))
    r2 = _reference(*b)
    assert jnp.allclose(l2, r2, rtol=1e-5, atol=1e-6), (l2, r2)

    # Case 3: element count not a multiple of 128 -> zero-weight padding path.
    c = make(jax.random.PRNGKey(2), (10, 14))
    l3 = jax.block_until_ready(weighted_bce_loss(*c))
    r3 = _reference(*c)
    assert jnp.allclose(l3, r3, rtol=1e-5, atol=1e-6), (l3, r3)

    # Case 4: bf16 storage streamed at 2 bytes/elem, upcast in-vreg.
    d = make(jax.random.PRNGKey(3), (16, 32), dtype=jnp.bfloat16)
    l4 = jax.block_until_ready(weighted_bce_loss(*d))
    r4 = _reference(*d)
    assert jnp.allclose(l4, r4, rtol=1e-5, atol=1e-6), (l4, r4)

    print("KERNEL_OK")
</pallas_src>

<mosaic_0001>
module attributes {stable_mosaic.version = 11 : i64} {
  func.func @_wbce_kernel(%arg0: i32, %arg1: i32, %arg2: memref<1x256xf32, #tpu.memory_space<vmem>>, %arg3: memref<1x256xf32, #tpu.memory_space<vmem>>, %arg4: memref<1x256xf32, #tpu.memory_space<vmem>>, %arg5: memref<1x8x256xf32, #tpu.memory_space<vmem>>, %arg6: memref<1x8x256xf32, #tpu.memory_space<vmem>>) attributes {dimension_semantics = [#tpu.dimension_semantics<parallel>, #tpu.dimension_semantics<arbitrary>], iteration_bounds = array<i64: 1, 1>, scalar_prefetch = 0 : i64, scratch_operands = 0 : i64, tpu.core_type = #tpu.core_type<tc>, window_params = [{transform_indices = @transform_0, window_bounds = array<i64: 1, 256>}, {transform_indices = @transform_1, window_bounds = array<i64: 1, 256>}, {transform_indices = @transform_2, window_bounds = array<i64: 1, 256>}, {transform_indices = @transform_3, window_bounds = array<i64: 1, 8, 256>}, {transform_indices = @transform_4, window_bounds = array<i64: 1, 8, 256>}]} {
    %c0_i32 = arith.constant 0 : i32
    %0 = arith.cmpi eq, %arg1, %c0_i32 : i32
    %1 = arith.extui %0 : i1 to i32
    %c0_i32_0 = arith.constant 0 : i32
    %2 = arith.cmpi ne, %1, %c0_i32_0 : i32
    scf.if %2 {
      %cst_25 = arith.constant 0.000000e+00 : f32
      %46 = vector.broadcast %cst_25 : f32 to vector<1x8x256xf32>
      %c0_26 = arith.constant 0 : index
      %c0_27 = arith.constant 0 : index
      %c0_28 = arith.constant 0 : index
      %47 = vector.load %arg5[%c0_26, %c0_27, %c0_28] : memref<1x8x256xf32, #tpu.memory_space<vmem>>, vector<1x8x256xf32>
      tpu.vector_store %arg5[%c0_26, %c0_27, %c0_28], %46 {strides = array<i32>} : memref<1x8x256xf32, #tpu.memory_space<vmem>>, vector<1x8x256xf32>,
      %cst_29 = arith.constant 0.000000e+00 : f32
      %48 = vector.broadcast %cst_29 : f32 to vector<1x8x256xf32>
      %c0_30 = arith.constant 0 : index
      %c0_31 = arith.constant 0 : index
      %c0_32 = arith.constant 0 : index
      %49 = vector.load %arg6[%c0_30, %c0_31, %c0_32] : memref<1x8x256xf32, #tpu.memory_space<vmem>>, vector<1x8x256xf32>
      tpu.vector_store %arg6[%c0_30, %c0_31, %c0_32], %48 {strides = array<i32>} : memref<1x8x256xf32, #tpu.memory_space<vmem>>, vector<1x8x256xf32>,
    } else {
    }
    %c0 = arith.constant 0 : index
    %c0_1 = arith.constant 0 : index
    %3 = vector.load %arg2[%c0, %c0_1] : memref<1x256xf32, #tpu.memory_space<vmem>>, vector<1x256xf32>
    %c0_2 = arith.constant 0 : index
    %c0_3 = arith.constant 0 : index
    %4 = vector.load %arg3[%c0_2, %c0_3] : memref<1x256xf32, #tpu.memory_space<vmem>>, vector<1x256xf32>
    %c0_4 = arith.constant 0 : index
    %c0_5 = arith.constant 0 : index
    %5 = vector.load %arg4[%c0_4, %c0_5] : memref<1x256xf32, #tpu.memory_space<vmem>>, vector<1x256xf32>
    %cst = arith.constant 0.000000e+00 : f32
    %6 = vector.broadcast %cst : f32 to vector<1x256xf32>
    %7 = arith.maximumf %3, %6 : vector<1x256xf32>
    %8 = arith.mulf %3, %4 : vector<1x256xf32>
    %9 = arith.subf %7, %8 : vector<1x256xf32>
    %10 = math.absf %3 : vector<1x256xf32>
    %cst_6 = arith.constant 0.000000e+00 : f32
    %11 = vector.broadcast %cst_6 : f32 to vector<1x256xf32>
    %12 = arith.subf %11, %10 : vector<1x256xf32>
    %13 = math.exp %12 : vector<1x256xf32>
    %14 = math.log1p %13 : vector<1x256xf32>
    %15 = arith.addf %9, %14 : vector<1x256xf32>
    %16 = arith.mulf %5, %15 : vector<1x256xf32>
    %17 = tpu.iota {dimensions = array<i32: 0>} : vector<8x256xi32>
    %18 = tpu.iota {dimensions = array<i32: 1>} : vector<8x256xi32>
    %c0_i32_7 = arith.constant 0 : i32
    %19 = vector.broadcast %c0_i32_7 : i32 to vector<8x256xi32>
    %20 = arith.cmpi eq, %17, %19 : vector<8x256xi32>
    %c0_i32_8 = arith.constant 0 : i32
    %21 = vector.broadcast %c0_i32_8 : i32 to vector<8x256xi32>
    %22 = arith.cmpi eq, %18, %21 : vector<8x256xi32>
    %23 = arith.andi %20, %22 : vector<8x256xi1>
    %c0_9 = arith.constant 0 : index
    %c0_10 = arith.constant 0 : index
    %c0_11 = arith.constant 0 : index
    %24 = vector.load %arg5[%c0_9, %c0_10, %c0_11] : memref<1x8x256xf32, #tpu.memory_space<vmem>>, vector<1x8x256xf32>
    %25 = vector.shape_cast %16 : vector<1x256xf32> to vector<1x1x256xf32>
    %cst_12 = arith.constant dense<0.000000e+00> : vector<1xf32>
    %26 = vector.multi_reduction <add>, %25, %cst_12 [1, 2] : vector<1x1x256xf32> to vector<1xf32>
    %27 = vector.shape_cast %26 : vector<1xf32> to vector<1x1x1xf32>
    %28 = vector.extract %27[0, 0, 0] : f32 from vector<1x1x1xf32>
    %cst_13 = arith.constant 0.000000e+00 : f32
    %29 = vector.broadcast %28 : f32 to vector<8x256xf32>
    %30 = vector.broadcast %cst_13 : f32 to vector<8x256xf32>
    %31 = arith.select %23, %29, %30 : vector<8x256xi1>, vector<8x256xf32>
    %32 = vector.shape_cast %31 : vector<8x256xf32> to vector<1x8x256xf32>
    %33 = arith.addf %24, %32 : vector<1x8x256xf32>
    %c0_14 = arith.constant 0 : index
    %c0_15 = arith.constant 0 : index
    %c0_16 = arith.constant 0 : index
    %34 = vector.load %arg5[%c0_14, %c0_15, %c0_16] : memref<1x8x256xf32, #tpu.memory_space<vmem>>, vector<1x8x256xf32>
    tpu.vector_store %arg5[%c0_14, %c0_15, %c0_16], %33 {strides = array<i32>} : memref<1x8x256xf32, #tpu.memory_space<vmem>>, vector<1x8x256xf32>,
    %c0_17 = arith.constant 0 : index
    %c0_18 = arith.constant 0 : index
    %c0_19 = arith.constant 0 : index
    %35 = vector.load %arg6[%c0_17, %c0_18, %c0_19] : memref<1x8x256xf32, #tpu.memory_space<vmem>>, vector<1x8x256xf32>
    %36 = vector.shape_cast %5 : vector<1x256xf32> to vector<1x1x256xf32>
    %cst_20 = arith.constant dense<0.000000e+00> : vector<1xf32>
    %37 = vector.multi_reduction <add>, %36, %cst_20 [1, 2] : vector<1x1x256xf32> to vector<1xf32>
    %38 = vector.shape_cast %37 : vector<1xf32> to vector<1x1x1xf32>
    %39 = vector.extract %38[0, 0, 0] : f32 from vector<1x1x1xf32>
    %cst_21 = arith.constant 0.000000e+00 : f32
    %40 = vector.broadcast %39 : f32 to vector<8x256xf32>
    %41 = vector.broadcast %cst_21 : f32 to vector<8x256xf32>
    %42 = arith.select %23, %40, %41 : vector<8x256xi1>, vector<8x256xf32>
    %43 = vector.shape_cast %42 : vector<8x256xf32> to vector<1x8x256xf32>
    %44 = arith.addf %35, %43 : vector<1x8x256xf32>
    %c0_22 = arith.constant 0 : index
    %c0_23 = arith.constant 0 : index
    %c0_24 = arith.constant 0 : index
    %45 = vector.load %arg6[%c0_22, %c0_23, %c0_24] : memref<1x8x256xf32, #tpu.memory_space<vmem>>, vector<1x8x256xf32>
    tpu.vector_store %arg6[%c0_22, %c0_23, %c0_24], %44 {strides = array<i32>} : memref<1x8x256xf32, #tpu.memory_space<vmem>>, vector<1x8x256xf32>,
    return
  }
  func.func @transform_0(%arg0: i32, %arg1: i32) -> (i32, i32) {
    %c1_i32 = arith.constant 1 : i32
    %0 = arith.muli %arg0, %c1_i32 : i32
    %1 = arith.addi %0, %arg1 : i32
    %c0_i32 = arith.constant 0 : i32
    %2 = arith.minsi %1, %c0_i32 : i32
    %c0_i32_0 = arith.constant 0 : i32
    %c0_i32_1 = arith.constant 0 : i32
    return %2, %c0_i32_0 : i32, i32
  }
  func.func @transform_1(%arg0: i32, %arg1: i32) -> (i32, i32) {
    %c1_i32 = arith.constant 1 : i32
    %0 = arith.muli %arg0, %c1_i32 : i32
    %1 = arith.addi %0, %arg1 : i32
    %c0_i32 = arith.constant 0 : i32
    %2 = arith.minsi %1, %c0_i32 : i32
    %c0_i32_0 = arith.constant 0 : i32
    %c0_i32_1 = arith.constant 0 : i32
    return %2, %c0_i32_0 : i32, i32
  }
  func.func @transform_2(%arg0: i32, %arg1: i32) -> (i32, i32) {
    %c1_i32 = arith.constant 1 : i32
    %0 = arith.muli %arg0, %c1_i32 : i32
    %1 = arith.addi %0, %arg1 : i32
    %c0_i32 = arith.constant 0 : i32
    %2 = arith.minsi %1, %c0_i32 : i32
    %c0_i32_0 = arith.constant 0 : i32
    %c0_i32_1 = arith.constant 0 : i32
    return %2, %c0_i32_0 : i32, i32
  }
  func.func @transform_3(%arg0: i32, %arg1: i32) -> (i32, i32, i32) {
    %c0_i32 = arith.constant 0 : i32
    %c0_i32_0 = arith.constant 0 : i32
    %c0_i32_1 = arith.constant 0 : i32
    return %arg0, %c0_i32, %c0_i32_0 : i32, i32, i32
  }
  func.func @transform_4(%arg0: i32, %arg1: i32) -> (i32, i32, i32) {
    %c0_i32 = arith.constant 0 : i32
    %c0_i32_0 = arith.constant 0 : i32
    %c0_i32_1 = arith.constant 0 : i32
    return %arg0, %c0_i32, %c0_i32_0 : i32, i32, i32
  }
}

</mosaic_0001>

<bundles_post_ra>
// kernel: tpu_custom_call.1
= control target key start
LH: loop header
LB: loop body
LE: loop exit
PB: predicated region body
PF: predicated region fallthrough
CT: control target
= control target key end

     0   :  { %10 = vsyncpa [#allocation3], 0  ;;  %s411_s0 = inlined_call_operand.hbm [shape: f32[1,256], index: 0, kind: input, shape index: {}]   ;;  %s412_s1 = inlined_call_operand.hbm [shape: f32[1,256], index: 1, kind: input, shape index: {}]   ;;  %s413_s2 = inlined_call_operand.hbm [shape: f32[1,256], index: 2, kind: input, shape index: {}]   ;;  %s414_s3 = inlined_call_operand.hbm [shape: f32[1,8,256], index: 3, kind: output, shape index: {0}]   ;;  %s415_s4 = inlined_call_operand.hbm [shape: f32[1,8,256], index: 4, kind: output, shape index: {1}]  }
   0x1   :  { %11 = vsyncpa [#allocation6], 0 }
   0x2   :  { %12 = vsyncpa [#allocation4], 0  ;;  %s40_s17 = sshll.u32 %s412_s1, 4  ;;  %s41_s17 = int_to_ptr.hbm [resolvable:$true] %s40_s17 }
   0x3   :  { %13 = vsyncpa [#allocation10], 0  ;;  %s357_s18 = smov [#allocation5]   ;;  %s24_s22 = sshll.u32 %s411_s0, 4  ;;  %s25_s22 = int_to_ptr.hbm [resolvable:$true] %s24_s22 }
   0x4   :  { %s42_s19 = sshll.u32 %s357_s18, 4  ;;  %s358_s23 = smov [#allocation2]   ;;  %s43_s19 = int_to_ptr.vmem [resolvable:$true] %s42_s19 }
   0x5   :  { %45 = dma.hbm_to_vmem [thread:$0]  %s41_s17, 32, %s43_s19, [#allocation6]  }
   0x6   :  { %s26_s24 = sshll.u32 %s358_s23, 4  ;;  %s56_s27 = sshll.u32 %s413_s2, 4  ;;  %s27_s24 = int_to_ptr.vmem [resolvable:$true] %s26_s24  ;;  %s57_s27 = int_to_ptr.hbm [resolvable:$true] %s56_s27 }
   0x7   :  { %29 = dma.hbm_to_vmem [thread:$0]  %s25_s22, 32, %s27_s24, [#allocation3]  }
   0x8   :  { %s359_s1 = smov [#allocation7]  }
   0x9   :  { %s58_s28 = sshll.u32 %s359_s1, 4  ;;  %s59_s28 = int_to_ptr.vmem [resolvable:$true] %s58_s28 }
   0xa   :  { %61 = dma.hbm_to_vmem [thread:$0]  %s57_s27, 32, %s59_s28, [#allocation6]  }
   0xb   :  { %349 = dma.done.wait [#allocation3], 32  }
   0xc   :  { %350 = vsyncadd [#allocation3], 4294967264 }
   0xd   :  { %351 = dma.done.wait [#allocation6], 64  }
   0xe   :  { %352 = vsyncadd [#allocation6], 4294967232  ;;  %v91_v0 = vld [vmem:[#allocation2] sm:$0x3]  ;;  %v92_v7 = vld [vmem:[#allocation5] sm:$0x3]  ;;  %v112_v45 = vlaneseq }
   0xf   :  { %v97_v1 = vand.u32 2147483647, %v91_v0  ;;  %v94_v9 = vmax.f32 %v91_v0, 0.0  ;;  %v95_v10 = vmul.f32 %v92_v7, %v91_v0  ;;  %v93_v16 = vld [vmem:[#allocation7] sm:$0x3]  ;;  %vm129_vm1 = vcmask 1040384  }
  0x10   :  { %v152_v24 = vperm.slane %v93_v16, 0  ;;  %v153_v25 = vperm.slane %v93_v16, 1  ;;  %v360_v30 = vmov 0.0   ;;  %v113_v46 = vshrl.u32 %v112_v45, 7  ;;  %s361_s0 = smov [#allocation8]   ;;  %s182_s6 = sshll.u32 %s414_s3, 4  ;;  %s183_s6 = int_to_ptr.hbm [resolvable:$true] %s182_s6 }
  0x11   :  { %v98_v2 = vsub.f32 0.0, %v97_v1  ;;  %v96_v14 = vsub.f32 %v94_v9, %v95_v10  ;;  %148 = vst [vmem:[#allocation8 + $0x8] sm:$0xff] %v360_v30  ;;  %v115_v47 = vand.u32 127, %v112_v45  ;;  %s180_s2 = sshll.u32 %s361_s0, 4  ;;  %s362_s7 = smov [#allocation9]   ;;  %s181_s2 = int_to_ptr.vmem [resolvable:$true] %s180_s2 }
  0x12   :  { %v156_v27 = vsel %vm129_vm1, %v152_v24, 0.0  ;;  %v157_v28 = vsel %vm129_vm1, %v153_v25, 0.0  ;;  %174 = vst [vmem:[#allocation9 + $0x8] sm:$0xff] %v360_v30  ;;  %vm117_vm2 = vcmp.eq.s32.totalorder %v113_v46, 0  ;;  %s191_s8 = sshll.u32 %s362_s7, 4  ;;  %s193_s12 = sshll.u32 %s415_s4, 4  ;;  %s192_s8 = int_to_ptr.vmem [resolvable:$true] %s191_s8  ;;  %s194_s12 = int_to_ptr.hbm [resolvable:$true] %s193_s12 }
  0x13   :  { %v99_v3 = vmul.f32 1.442695, %v98_v2  ;;  %v158_v29 = vadd.f32 %v157_v28, %v156_v27  ;;  %vm118_vm3 = vcmp.eq.s32.totalorder %v115_v47, 0 }
  0x14   :  { %vm397_vm4 = vmand %vm117_vm2, %vm118_vm3 }
  0x15   :  { %225 = vpow2.f32 %v99_v3 }
  0x1b   :  { %v226_v4 = vpop.eup %225 }
  0x1c   :  { %v101_v5 = vadd.f32 1.0, %v226_v4  ;;  %v104_v6 = vmul.f32 -0.5, %v226_v4  ;;  %v107_v11 = vand.u32 2147483647, %v226_v4 }
  0x1e   :  { %227 = vlog2.f32 %v101_v5  ;;  %v105_v8 = vadd.f32 1.0, %v104_v6  ;;  %vm108_vm0 = vcmp.lt.f32.partialorder %v107_v11, 0.0004427343 }
  0x20   :  { %v106_v12 = vmul.f32 %v226_v4, %v105_v8 }
  0x24   :  { %v228_v13 = vpop.eup %227 }
  0x25   :  { %v103_v15 = vmul.f32 0.6931472, %v228_v13 }
  0x27   :  { %v109_v17 = vsel %vm108_vm0, %v106_v12, %v103_v15 }
  0x28   :  { %v110_v18 = vadd.f32 %v109_v17, %v96_v14 }
  0x2a   :  { %v111_v19 = vmul.f32 %v110_v18, %v93_v16 }
  0x2c   :  { %v125_v20 = vperm.slane %v111_v19, 0  ;;  %v126_v21 = vperm.slane %v111_v19, 1 }
  0x2e   :  { %v130_v22 = vsel %vm129_vm1, %v125_v20, 0.0  ;;  %v131_v23 = vsel %vm129_vm1, %v126_v21, 0.0 }
  0x2f   :  { %v132_v26 = vadd.f32 %v131_v23, %v130_v22 }
  0x31   :  { %133 = vadd.xlane.f32.xlu0 %v132_v26 }
  0x39   :  { %159 = vadd.xlane.f32.xlu0 %v158_v29 }
  0xa4   :  { %v134_v31 = vpop.xlane.xlu0 %133 }
  0xa5   :  { %v135_v32 = vrot.slane %v134_v31, 4 }
  0xa7   :  { %v136_v33 = vadd.f32 %v135_v32, %v134_v31 }
  0xa9   :  { %v137_v34 = vrot.slane %v136_v33, 2 }
  0xab   :  { %v138_v35 = vadd.f32 %v137_v34, %v136_v33 }
  0xac   :  { %v160_v36 = vpop.xlane.xlu0 %159 }
  0xad   :  { %v161_v37 = vrot.slane %v160_v36, 4  ;;  %v139_v38 = vrot.slane %v138_v35, 1 }
  0xaf   :  { %v162_v39 = vadd.f32 %v161_v37, %v160_v36  ;;  %v140_v40 = vadd.f32 %v139_v38, %v138_v35 }
  0xb1   :  { %v163_v41 = vrot.slane %v162_v39, 2  ;;  %215 = vpush %v140_v40 }
  0xb3   :  { %v164_v42 = vadd.f32 %v163_v41, %v162_v39 }
  0xb5   :  { %v165_v43 = vrot.slane %v164_v42, 1 }
  0xb7   :  { %v166_v44 = vadd.f32 %v165_v43, %v164_v42 }
  0xb9   :  { %217 = vpush %v166_v44 }
  0xe2   :  { %s216_s29 = spop %215 }
  0xe3   :  { %v142_v49 = vstv %s216_s29 }
  0xe4   :  { %v143_v50 = vsel %vm397_vm4, %v142_v49, 0.0 }
  0xe5   :  { %147 = vst [vmem:[#allocation8] sm:$0xff] %v143_v50 }
  0xe6   :  { %185 = dma.vmem_to_hbm [thread:$0]  %s181_s2, 256, %s183_s6, [#allocation4]  }
  0xea   :  { %s218_s9 = spop %217 }
  0xeb   :  { %v168_v51 = vstv %s218_s9 }
  0xec   :  { %v169_v52 = vsel %vm397_vm4, %v168_v51, 0.0 }
  0xed   :  { %173 = vst [vmem:[#allocation9] sm:$0xff] %v169_v52 }
  0xee   :  { %196 = dma.vmem_to_hbm [thread:$0]  %s192_s8, 256, %s194_s12, [#allocation10]  }
  0xef   :  { %353 = dma.done.wait [#allocation4], 256  }
  0xf0   :  { %354 = vsyncadd [#allocation4], 4294967040 }
  0xf1   :  { %355 = dma.done.wait [#allocation10], 256  }
  0xf2   :  { %356 = vsyncadd [#allocation10], 4294967040 }
  0xf3   :  { %205 = vsyncpa [#allocation3], 1 }
  0xf4   :  { %206 = vsyncpa [#allocation6], 1 }
  0xf5   :  { %207 = vsyncpa [#allocation4], 1 }
  0xf6   :  { %208 = vsyncpa [#allocation10], 1 }

</bundles_post_ra>
